<compile_context>
chip_gen: v6e
topology: v6e:2x2x1
jax: 0.10.0
libtpu: 0.0.40
codegen_flags: <defaults>
</compile_context>

<pallas_src>
import math
from functools import partial

import jax
import jax.numpy as jnp
from jax import lax
from jax.experimental import pallas as pl
from jax.experimental.pallas import tpu as pltpu


def _pick_q_tile(n):
    """Largest query tile that divides N (keeps (8,128) rule: tile%8==0 or tile==N)."""
    for t in (512, 256, 128):
        if n % t == 0:
            return t
    return n


def _mha_block_kernel(x_ref, gamma_ref, beta_ref, wqkv_ref, wproj_ref, bproj_ref,
                      o_ref, q_s, k_s, v_s,
                      *, num_heads, head_dim, tq, skip_lam, ln_eps, mm_dtype):
    """Grid = (batch, query-tile). qi==0 fills the per-batch Q/K/V scratch; every qi consumes it."""
    C = x_ref.shape[2]
    H, hd = num_heads, head_dim
    HD = H * hd

    qi = pl.program_id(1)
    q_start = pl.multiple_of(qi * tq, tq)

    # ---- once per batch element: LayerNorm(full seq) + fused QKV projection -> VMEM scratch ----
    @pl.when(qi == 0)
    def _():
        gamma = gamma_ref[0]                            # (C,) f32
        beta = beta_ref[0]                              # (C,) f32
        xs = x_ref[0] * skip_lam                        # (N, C) f32
        mu = jnp.mean(xs, axis=-1, keepdims=True)
        d = xs - mu
        var = jnp.mean(d * d, axis=-1, keepdims=True)   # biased variance, like torch LayerNorm
        xn = ((d * lax.rsqrt(var + ln_eps)) * gamma + beta).astype(mm_dtype)
        # One big MXU pass; attention scale already folded into the Q columns of wqkv.
        qkv = jnp.dot(xn, wqkv_ref[...], preferred_element_type=jnp.float32)   # (N, 3*HD) f32
        q_s[...] = qkv[:, 0:HD].astype(mm_dtype)
        k_s[...] = qkv[:, HD:2 * HD].astype(mm_dtype)
        v_s[...] = qkv[:, 2 * HD:3 * HD].astype(mm_dtype)

    # ---- per query tile ----
    xq_raw = x_ref[0, pl.ds(q_start, tq), :]            # (TQ, C) f32 — residual rows
    q = q_s[pl.ds(q_start, tq), :]                      # (TQ, HD) mm_dtype (pre-scaled)
    k = k_s[...]                                        # (N,  HD) mm_dtype
    v = v_s[...]                                        # (N,  HD) mm_dtype

    nt_dims = (((1,), (1,)), ((), ()))   # contract last dims: (M,K) x (N,K) -> (M,N), no transpose

    # Heads fold straight into the output-projection accumulator (single lane-dense (TQ, C)).
    acc = jnp.zeros((tq, C), jnp.float32)
    for h in range(H):                                  # static loop, unrolled
        lo, hi = h * hd, (h + 1) * hd
        s = lax.dot_general(q[:, lo:hi], k[:, lo:hi], nt_dims,
                            preferred_element_type=jnp.float32)          # (TQ, N) f32
        s = s - jnp.max(s, axis=-1, keepdims=True)
        p = jnp.exp(s)
        p = p * pl.reciprocal(jnp.sum(p, axis=-1, keepdims=True), approx=True)
        oh = jnp.dot(p.astype(mm_dtype), v[:, lo:hi],
                     preferred_element_type=jnp.float32)                 # (TQ, hd) f32
        acc = acc + jnp.dot(oh.astype(mm_dtype), wproj_ref[lo:hi, :],
                            preferred_element_type=jnp.float32)          # (TQ, C) f32

    # 1/skip_lam already folded into wproj / bproj host-side.
    o_ref[0] = (xq_raw + acc + bproj_ref[0]).astype(o_ref.dtype)


def mha_block(x, gamma, beta, wqkv, wproj, bproj, *, num_heads, head_dim,
              skip_lam=1.0, ln_eps=1e-5, mm_dtype=jnp.bfloat16, q_tile=None):
    B, N, C = x.shape
    HD = num_heads * head_dim
    assert wqkv.shape == (C, 3 * HD)
    assert wproj.shape == (HD, C)

    # Host-side folds (free): attention scale into the Q columns of wqkv, 1/skip_lam into the
    # output projection. Weights cast to the matmul dtype (bf16 default) -> half resident VMEM,
    # MXU runs bf16-native. All elementwise math / accumulation stays f32 in-kernel.
    scale = head_dim ** (-0.5)
    inv_lam = 1.0 / float(skip_lam)
    col_scale = jnp.concatenate([jnp.full((HD,), scale, jnp.float32),
                                 jnp.ones((2 * HD,), jnp.float32)])
    wqkv_s = (wqkv.astype(jnp.float32) * col_scale[None, :]).astype(mm_dtype)
    wp = (wproj.astype(jnp.float32) * inv_lam).astype(mm_dtype)
    bp = (bproj.astype(jnp.float32) * inv_lam)

    tq = q_tile if q_tile is not None else _pick_q_tile(N)
    assert N % tq == 0
    nq = N // tq

    kernel = partial(_mha_block_kernel, num_heads=num_heads, head_dim=head_dim,
                     tq=tq, skip_lam=float(skip_lam), ln_eps=float(ln_eps),
                     mm_dtype=mm_dtype)

    return pl.pallas_call(
        kernel,
        out_shape=jax.ShapeDtypeStruct((B, N, C), x.dtype),
        grid=(B, nq),
        in_specs=[
            pl.BlockSpec((1, N, C), lambda b, qi: (b, 0, 0)),      # x: full seq (re-DMA only on b change)
            pl.BlockSpec((1, C), lambda b, qi: (0, 0)),            # LN gamma
            pl.BlockSpec((1, C), lambda b, qi: (0, 0)),            # LN beta
            pl.BlockSpec((C, 3 * HD), lambda b, qi: (0, 0)),       # fused Wqkv (Q cols pre-scaled)
            pl.BlockSpec((HD, C), lambda b, qi: (0, 0)),           # Wproj (pre-scaled by 1/skip_lam)
            pl.BlockSpec((1, C), lambda b, qi: (0, 0)),            # proj bias (pre-scaled)
        ],
        out_specs=pl.BlockSpec((1, tq, C), lambda b, qi: (b, qi, 0)),
        scratch_shapes=[
            pltpu.VMEM((N, HD), mm_dtype),                         # Q  (per-batch carry)
            pltpu.VMEM((N, HD), mm_dtype),                         # K
            pltpu.VMEM((N, HD), mm_dtype),                         # V
        ],
        compiler_params=pltpu.CompilerParams(
            dimension_semantics=("parallel", "arbitrary"),         # qi carries scratch -> arbitrary
            vmem_limit_bytes=48 * 1024 * 1024,
        ),
    )(x, gamma, beta, wqkv_s, wp, bp)


def mha_block_reference(x, gamma, beta, wqkv, wproj, bproj, *, num_heads, head_dim,
                        skip_lam=1.0, ln_eps=1e-5):
    """Pure-JAX f32 reference mirroring the PyTorch forward."""
    B, N, C = x.shape
    xs = x * skip_lam
    mean = xs.mean(-1, keepdims=True)
    var = ((xs - mean) ** 2).mean(-1, keepdims=True)
    xn = (xs - mean) / jnp.sqrt(var + ln_eps) * gamma[0] + beta[0]
    qkv = xn @ wqkv                                                   # (B, N, 3*H*hd)
    qkv = qkv.reshape(B, N, 3, num_heads, head_dim).transpose(2, 0, 3, 1, 4)
    q, k, v = qkv[0], qkv[1], qkv[2]                                  # (B, H, N, hd)
    attn = (q * head_dim ** (-0.5)) @ jnp.swapaxes(k, -2, -1)         # (B, H, N, N)
    attn = jax.nn.softmax(attn, axis=-1)
    out = (attn @ v).transpose(0, 2, 1, 3).reshape(B, N, num_heads * head_dim)
    out = out @ wproj + bproj[0]
    return x + out / skip_lam


def _run_case(key, B, N, C, num_heads, head_dim, skip_lam, q_tile=None):
    kx, kg, kb, kqkv, kproj, kbp = jax.random.split(key, 6)
    HD = num_heads * head_dim
    x = jax.random.normal(kx, (B, N, C), dtype=jnp.float32)
    gamma = 1.0 + 0.1 * jax.random.normal(kg, (1, C), dtype=jnp.float32)
    beta = 0.1 * jax.random.normal(kb, (1, C), dtype=jnp.float32)
    # Linear weights stored transposed for x @ W (PyTorch stores (out, in)).
    wqkv = jax.random.normal(kqkv, (C, 3 * HD), dtype=jnp.float32) / math.sqrt(C)
    wproj = jax.random.normal(kproj, (HD, C), dtype=jnp.float32) / math.sqrt(HD)
    bproj = 0.05 * jax.random.normal(kbp, (1, C), dtype=jnp.float32)

    ref = mha_block_reference(x, gamma, beta, wqkv, wproj, bproj,
                              num_heads=num_heads, head_dim=head_dim, skip_lam=skip_lam)

    # f32 matmul path: tight check (only approx-reciprocal differs from the reference).
    out_f32 = jax.block_until_ready(
        mha_block(x, gamma, beta, wqkv, wproj, bproj, num_heads=num_heads,
                  head_dim=head_dim, skip_lam=skip_lam, mm_dtype=jnp.float32,
                  q_tile=q_tile))
    assert out_f32.shape == (B, N, C)
    assert jnp.allclose(out_f32, ref, atol=2e-2, rtol=2e-2), \
        float(jnp.max(jnp.abs(out_f32 - ref)))

    # bf16 matmul path (default / production): looser check.
    out_bf16 = jax.block_until_ready(
        mha_block(x, gamma, beta, wqkv, wproj, bproj, num_heads=num_heads,
                  head_dim=head_dim, skip_lam=skip_lam, mm_dtype=jnp.bfloat16,
                  q_tile=q_tile))
    assert out_bf16.shape == (B, N, C)
    assert jnp.allclose(out_bf16, ref, atol=1e-1, rtol=1e-1), \
        float(jnp.max(jnp.abs(out_bf16 - ref)))


if __name__ == "__main__":
    root = jax.random.PRNGKey(0)
    # Tiny shapes consistent with the module (dim=32, num_heads=4 -> head_dim=8); grid (2, 1).
    _run_case(jax.random.fold_in(root, 0), B=2, N=8, C=32, num_heads=4, head_dim=8,
              skip_lam=2.0)
    # Longer sequence to exercise the scratch carry across query tiles (N=256, TQ=128 -> grid (2, 2)).
    _run_case(jax.random.fold_in(root, 1), B=2, N=256, C=64, num_heads=4, head_dim=16,
              skip_lam=1.0, q_tile=128)

    print("KERNEL_OK")
</pallas_src>

<mosaic_0001>
module attributes {stable_mosaic.version = 11 : i64} {
  func.func @_mha_block_kernel(%arg0: i32, %arg1: i32, %arg2: memref<1x8x32xf32, #tpu.memory_space<vmem>>, %arg3: memref<1x32xf32, #tpu.memory_space<vmem>>, %arg4: memref<1x32xf32, #tpu.memory_space<vmem>>, %arg5: memref<32x96xf32, #tpu.memory_space<vmem>>, %arg6: memref<32x32xf32, #tpu.memory_space<vmem>>, %arg7: memref<1x32xf32, #tpu.memory_space<vmem>>, %arg8: memref<1x8x32xf32, #tpu.memory_space<vmem>>, %arg9: memref<8x32xf32, #tpu.memory_space<vmem>>, %arg10: memref<8x32xf32, #tpu.memory_space<vmem>>, %arg11: memref<8x32xf32, #tpu.memory_space<vmem>>) attributes {dimension_semantics = [#tpu.dimension_semantics<parallel>, #tpu.dimension_semantics<arbitrary>], iteration_bounds = array<i64: 2, 1>, scalar_prefetch = 0 : i64, scratch_operands = 3 : i64, tpu.core_type = #tpu.core_type<tc>, window_params = [{transform_indices = @transform_0, window_bounds = array<i64: 1, 8, 32>}, {pipeline_mode = #tpu.pipeline_mode<synchronous>, transform_indices = @transform_1, window_bounds = array<i64: 1, 32>}, {pipeline_mode = #tpu.pipeline_mode<synchronous>, transform_indices = @transform_2, window_bounds = array<i64: 1, 32>}, {pipeline_mode = #tpu.pipeline_mode<synchronous>, transform_indices = @transform_3, window_bounds = array<i64: 32, 96>}, {pipeline_mode = #tpu.pipeline_mode<synchronous>, transform_indices = @transform_4, window_bounds = array<i64: 32, 32>}, {pipeline_mode = #tpu.pipeline_mode<synchronous>, transform_indices = @transform_5, window_bounds = array<i64: 1, 32>}, {transform_indices = @transform_6, window_bounds = array<i64: 1, 8, 32>}]} {
    %c8_i32 = arith.constant 8 : i32
    %0 = arith.muli %arg1, %c8_i32 : i32
    %1 = tpu.assume_multiple %0, 8 : i32
    %c0_i32 = arith.constant 0 : i32
    %2 = arith.cmpi eq, %arg1, %c0_i32 : i32
    %3 = arith.extui %2 : i1 to i32
    %c0_i32_0 = arith.constant 0 : i32
    %4 = arith.cmpi ne, %3, %c0_i32_0 : i32
    scf.if %4 {
      %c0_37 = arith.constant 0 : index
      %c0_38 = arith.constant 0 : index
      %94 = vector.load %arg3[%c0_37, %c0_38] : memref<1x32xf32, #tpu.memory_space<vmem>>, vector<1x32xf32>
      %95 = vector.shape_cast %94 : vector<1x32xf32> to vector<32xf32>
      %c0_39 = arith.constant 0 : index
      %c0_40 = arith.constant 0 : index
      %96 = vector.load %arg4[%c0_39, %c0_40] : memref<1x32xf32, #tpu.memory_space<vmem>>, vector<1x32xf32>
      %97 = vector.shape_cast %96 : vector<1x32xf32> to vector<32xf32>
      %c0_41 = arith.constant 0 : index
      %c0_42 = arith.constant 0 : index
      %c0_43 = arith.constant 0 : index
      %98 = vector.load %arg2[%c0_41, %c0_42, %c0_43] : memref<1x8x32xf32, #tpu.memory_space<vmem>>, vector<1x8x32xf32>
      %99 = vector.shape_cast %98 : vector<1x8x32xf32> to vector<8x32xf32>
      %cst_44 = arith.constant 2.000000e+00 : f32
      %100 = vector.broadcast %cst_44 : f32 to vector<8x32xf32>
      %101 = arith.mulf %99, %100 : vector<8x32xf32>
      %cst_45 = arith.constant dense<0.000000e+00> : vector<8xf32>
      %102 = vector.multi_reduction <add>, %101, %cst_45 [1] : vector<8x32xf32> to vector<8xf32>
      %103 = vector.shape_cast %102 : vector<8xf32> to vector<8x1xf32>
      %cst_46 = arith.constant 3.200000e+01 : f32
      %104 = vector.broadcast %cst_46 : f32 to vector<8x1xf32>
      %105 = arith.divf %103, %104 : vector<8x1xf32>
      %106 = vector.broadcast %105 : vector<8x1xf32> to vector<8x32xf32>
      %107 = arith.subf %101, %106 : vector<8x32xf32>
      %108 = arith.mulf %107, %107 : vector<8x32xf32>
      %cst_47 = arith.constant dense<0.000000e+00> : vector<8xf32>
      %109 = vector.multi_reduction <add>, %108, %cst_47 [1] : vector<8x32xf32> to vector<8xf32>
      %110 = vector.shape_cast %109 : vector<8xf32> to vector<8x1xf32>
      %cst_48 = arith.constant 3.200000e+01 : f32
      %111 = vector.broadcast %cst_48 : f32 to vector<8x1xf32>
      %112 = arith.divf %110, %111 : vector<8x1xf32>
      %cst_49 = arith.constant 9.99999974E-6 : f32
      %113 = vector.broadcast %cst_49 : f32 to vector<8x1xf32>
      %114 = arith.addf %112, %113 : vector<8x1xf32>
      %115 = math.rsqrt %114 : vector<8x1xf32>
      %116 = vector.broadcast %115 : vector<8x1xf32> to vector<8x32xf32>
      %117 = arith.mulf %107, %116 : vector<8x32xf32>
      %118 = vector.shape_cast %95 : vector<32xf32> to vector<1x32xf32>
      %119 = vector.broadcast %118 : vector<1x32xf32> to vector<8x32xf32>
      %120 = arith.mulf %117, %119 : vector<8x32xf32>
      %121 = vector.shape_cast %97 : vector<32xf32> to vector<1x32xf32>
      %122 = vector.broadcast %121 : vector<1x32xf32> to vector<8x32xf32>
      %123 = arith.addf %120, %122 : vector<8x32xf32>
      %c0_50 = arith.constant 0 : index
      %c0_51 = arith.constant 0 : index
      %124 = vector.load %arg5[%c0_50, %c0_51] : memref<32x96xf32, #tpu.memory_space<vmem>>, vector<32x96xf32>
      %cst_52 = arith.constant dense<0.000000e+00> : vector<8x96xf32>
      %125 = tpu.matmul %123, %124, %cst_52 {dimension_numbers = #tpu.dot_dimension_numbers<[1], [0], [0], [1], [0, 0, 1, 1], [], []>} : vector<8x32xf32>, vector<32x96xf32>, vector<8x96xf32> -> vector<8x96xf32>
      %126 = vector.extract_strided_slice %125 {offsets = [0, 0], sizes = [8, 32], strides = [1, 1]} : vector<8x96xf32> to vector<8x32xf32>
      %c0_53 = arith.constant 0 : index
      %c0_54 = arith.constant 0 : index
      %127 = vector.load %arg9[%c0_53, %c0_54] : memref<8x32xf32, #tpu.memory_space<vmem>>, vector<8x32xf32>
      tpu.vector_store %arg9[%c0_53, %c0_54], %126 {strides = array<i32>} : memref<8x32xf32, #tpu.memory_space<vmem>>, vector<8x32xf32>,
      %128 = vector.extract_strided_slice %125 {offsets = [0, 32], sizes = [8, 32], strides = [1, 1]} : vector<8x96xf32> to vector<8x32xf32>
      %c0_55 = arith.constant 0 : index
      %c0_56 = arith.constant 0 : index
      %129 = vector.load %arg10[%c0_55, %c0_56] : memref<8x32xf32, #tpu.memory_space<vmem>>, vector<8x32xf32>
      tpu.vector_store %arg10[%c0_55, %c0_56], %128 {strides = array<i32>} : memref<8x32xf32, #tpu.memory_space<vmem>>, vector<8x32xf32>,
      %130 = vector.extract_strided_slice %125 {offsets = [0, 64], sizes = [8, 32], strides = [1, 1]} : vector<8x96xf32> to vector<8x32xf32>
      %c0_57 = arith.constant 0 : index
      %c0_58 = arith.constant 0 : index
      %131 = vector.load %arg11[%c0_57, %c0_58] : memref<8x32xf32, #tpu.memory_space<vmem>>, vector<8x32xf32>
      tpu.vector_store %arg11[%c0_57, %c0_58], %130 {strides = array<i32>} : memref<8x32xf32, #tpu.memory_space<vmem>>, vector<8x32xf32>,
    } else {
    }
    %c0 = arith.constant 0 : index
    %5 = arith.index_cast %1 : i32 to index
    %c0_1 = arith.constant 0 : index
    %6 = vector.load %arg2[%c0, %5, %c0_1] : memref<1x8x32xf32, #tpu.memory_space<vmem>>, vector<1x8x32xf32>
    %7 = vector.shape_cast %6 : vector<1x8x32xf32> to vector<8x32xf32>
    %8 = arith.index_cast %1 : i32 to index
    %c0_2 = arith.constant 0 : index
    %9 = vector.load %arg9[%8, %c0_2] : memref<8x32xf32, #tpu.memory_space<vmem>>, vector<8x32xf32>
    %c0_3 = arith.constant 0 : index
    %c0_4 = arith.constant 0 : index
    %10 = vector.load %arg10[%c0_3, %c0_4] : memref<8x32xf32, #tpu.memory_space<vmem>>, vector<8x32xf32>
    %c0_5 = arith.constant 0 : index
    %c0_6 = arith.constant 0 : index
    %11 = vector.load %arg11[%c0_5, %c0_6] : memref<8x32xf32, #tpu.memory_space<vmem>>, vector<8x32xf32>
    %cst = arith.constant 0.000000e+00 : f32
    %12 = vector.broadcast %cst : f32 to vector<8x32xf32>
    %13 = vector.extract_strided_slice %9 {offsets = [0, 0], sizes = [8, 8], strides = [1, 1]} : vector<8x32xf32> to vector<8x8xf32>
    %14 = vector.extract_strided_slice %10 {offsets = [0, 0], sizes = [8, 8], strides = [1, 1]} : vector<8x32xf32> to vector<8x8xf32>
    %cst_7 = arith.constant dense<0.000000e+00> : vector<8x8xf32>
    %15 = tpu.matmul %13, %14, %cst_7 {dimension_numbers = #tpu.dot_dimension_numbers<[1], [1], [0], [0], [0, 0, 1, 0], [], []>} : vector<8x8xf32>, vector<8x8xf32>, vector<8x8xf32> -> vector<8x8xf32>
    %cst_8 = arith.constant dense<0xFF800000> : vector<8xf32>
    %16 = vector.multi_reduction <maximumf>, %15, %cst_8 [1] : vector<8x8xf32> to vector<8xf32>
    %17 = vector.shape_cast %16 : vector<8xf32> to vector<8x1xf32>
    %18 = vector.broadcast %17 : vector<8x1xf32> to vector<8x8xf32>
    %19 = arith.subf %15, %18 : vector<8x8xf32>
    %20 = math.exp %19 : vector<8x8xf32>
    %cst_9 = arith.constant dense<0.000000e+00> : vector<8xf32>
    %21 = vector.multi_reduction <add>, %20, %cst_9 [1] : vector<8x8xf32> to vector<8xf32>
    %22 = vector.shape_cast %21 : vector<8xf32> to vector<8x1xf32>
    %23 = tpu.reciprocal %22 {approx = true} : vector<8x1xf32> -> vector<8x1xf32>
    %24 = vector.broadcast %23 : vector<8x1xf32> to vector<8x8xf32>
    %25 = arith.mulf %20, %24 : vector<8x8xf32>
    %26 = vector.extract_strided_slice %11 {offsets = [0, 0], sizes = [8, 8], strides = [1, 1]} : vector<8x32xf32> to vector<8x8xf32>
    %cst_10 = arith.constant dense<0.000000e+00> : vector<8x8xf32>
    %27 = tpu.matmul %25, %26, %cst_10 {dimension_numbers = #tpu.dot_dimension_numbers<[1], [0], [0], [1], [0, 0, 1, 1], [], []>} : vector<8x8xf32>, vector<8x8xf32>, vector<8x8xf32> -> vector<8x8xf32>
    %c0_11 = arith.constant 0 : index
    %c0_12 = arith.constant 0 : index
    %28 = vector.load %arg6[%c0_11, %c0_12] : memref<32x32xf32, #tpu.memory_space<vmem>>, vector<8x32xf32>
    %cst_13 = arith.constant dense<0.000000e+00> : vector<8x32xf32>
    %29 = tpu.matmul %27, %28, %cst_13 {dimension_numbers = #tpu.dot_dimension_numbers<[1], [0], [0], [1], [0, 0, 1, 1], [], []>} : vector<8x8xf32>, vector<8x32xf32>, vector<8x32xf32> -> vector<8x32xf32>
    %30 = arith.addf %12, %29 : vector<8x32xf32>
    %31 = vector.extract_strided_slice %9 {offsets = [0, 8], sizes = [8, 8], strides = [1, 1]} : vector<8x32xf32> to vector<8x8xf32>
    %32 = vector.extract_strided_slice %10 {offsets = [0, 8], sizes = [8, 8], strides = [1, 1]} : vector<8x32xf32> to vector<8x8xf32>
    %cst_14 = arith.constant dense<0.000000e+00> : vector<8x8xf32>
    %33 = tpu.matmul %31, %32, %cst_14 {dimension_numbers = #tpu.dot_dimension_numbers<[1], [1], [0], [0], [0, 0, 1, 0], [], []>} : vector<8x8xf32>, vector<8x8xf32>, vector<8x8xf32> -> vector<8x8xf32>
    %cst_15 = arith.constant dense<0xFF800000> : vector<8xf32>
    %34 = vector.multi_reduction <maximumf>, %33, %cst_15 [1] : vector<8x8xf32> to vector<8xf32>
    %35 = vector.shape_cast %34 : vector<8xf32> to vector<8x1xf32>
    %36 = vector.broadcast %35 : vector<8x1xf32> to vector<8x8xf32>
    %37 = arith.subf %33, %36 : vector<8x8xf32>
    %38 = math.exp %37 : vector<8x8xf32>
    %cst_16 = arith.constant dense<0.000000e+00> : vector<8xf32>
    %39 = vector.multi_reduction <add>, %38, %cst_16 [1] : vector<8x8xf32> to vector<8xf32>
    %40 = vector.shape_cast %39 : vector<8xf32> to vector<8x1xf32>
    %41 = tpu.reciprocal %40 {approx = true} : vector<8x1xf32> -> vector<8x1xf32>
    %42 = vector.broadcast %41 : vector<8x1xf32> to vector<8x8xf32>
    %43 = arith.mulf %38, %42 : vector<8x8xf32>
    %44 = vector.extract_strided_slice %11 {offsets = [0, 8], sizes = [8, 8], strides = [1, 1]} : vector<8x32xf32> to vector<8x8xf32>
    %cst_17 = arith.constant dense<0.000000e+00> : vector<8x8xf32>
    %45 = tpu.matmul %43, %44, %cst_17 {dimension_numbers = #tpu.dot_dimension_numbers<[1], [0], [0], [1], [0, 0, 1, 1], [], []>} : vector<8x8xf32>, vector<8x8xf32>, vector<8x8xf32> -> vector<8x8xf32>
    %c8 = arith.constant 8 : index
    %c0_18 = arith.constant 0 : index
    %46 = vector.load %arg6[%c8, %c0_18] : memref<32x32xf32, #tpu.memory_space<vmem>>, vector<8x32xf32>
    %cst_19 = arith.constant dense<0.000000e+00> : vector<8x32xf32>
    %47 = tpu.matmul %45, %46, %cst_19 {dimension_numbers = #tpu.dot_dimension_numbers<[1], [0], [0], [1], [0, 0, 1, 1], [], []>} : vector<8x8xf32>, vector<8x32xf32>, vector<8x32xf32> -> vector<8x32xf32>
    %48 = arith.addf %30, %47 : vector<8x32xf32>
    %49 = vector.extract_strided_slice %9 {offsets = [0, 16], sizes = [8, 8], strides = [1, 1]} : vector<8x32xf32> to vector<8x8xf32>
    %50 = vector.extract_strided_slice %10 {offsets = [0, 16], sizes = [8, 8], strides = [1, 1]} : vector<8x32xf32> to vector<8x8xf32>
    %cst_20 = arith.constant dense<0.000000e+00> : vector<8x8xf32>
    %51 = tpu.matmul %49, %50, %cst_20 {dimension_numbers = #tpu.dot_dimension_numbers<[1], [1], [0], [0], [0, 0, 1, 0], [], []>} : vector<8x8xf32>, vector<8x8xf32>, vector<8x8xf32> -> vector<8x8xf32>
    %cst_21 = arith.constant dense<0xFF800000> : vector<8xf32>
    %52 = vector.multi_reduction <maximumf>, %51, %cst_21 [1] : vector<8x8xf32> to vector<8xf32>
    %53 = vector.shape_cast %52 : vector<8xf32> to vector<8x1xf32>
    %54 = vector.broadcast %53 : vector<8x1xf32> to vector<8x8xf32>
    %55 = arith.subf %51, %54 : vector<8x8xf32>
    %56 = math.exp %55 : vector<8x8xf32>
    %cst_22 = arith.constant dense<0.000000e+00> : vector<8xf32>
    %57 = vector.multi_reduction <add>, %56, %cst_22 [1] : vector<8x8xf32> to vector<8xf32>
    %58 = vector.shape_cast %57 : vector<8xf32> to vector<8x1xf32>
    %59 = tpu.reciprocal %58 {approx = true} : vector<8x1xf32> -> vector<8x1xf32>
    %60 = vector.broadcast %59 : vector<8x1xf32> to vector<8x8xf32>
    %61 = arith.mulf %56, %60 : vector<8x8xf32>
    %62 = vector.extract_strided_slice %11 {offsets = [0, 16], sizes = [8, 8], strides = [1, 1]} : vector<8x32xf32> to vector<8x8xf32>
    %cst_23 = arith.constant dense<0.000000e+00> : vector<8x8xf32>
    %63 = tpu.matmul %61, %62, %cst_23 {dimension_numbers = #tpu.dot_dimension_numbers<[1], [0], [0], [1], [0, 0, 1, 1], [], []>} : vector<8x8xf32>, vector<8x8xf32>, vector<8x8xf32> -> vector<8x8xf32>
    %c16 = arith.constant 16 : index
    %c0_24 = arith.constant 0 : index
    %64 = vector.load %arg6[%c16, %c0_24] : memref<32x32xf32, #tpu.memory_space<vmem>>, vector<8x32xf32>
    %cst_25 = arith.constant dense<0.000000e+00> : vector<8x32xf32>
    %65 = tpu.matmul %63, %64, %cst_25 {dimension_numbers = #tpu.dot_dimension_numbers<[1], [0], [0], [1], [0, 0, 1, 1], [], []>} : vector<8x8xf32>, vector<8x32xf32>, vector<8x32xf32> -> vector<8x32xf32>
    %66 = arith.addf %48, %65 : vector<8x32xf32>
    %67 = vector.extract_strided_slice %9 {offsets = [0, 24], sizes = [8, 8], strides = [1, 1]} : vector<8x32xf32> to vector<8x8xf32>
    %68 = vector.extract_strided_slice %10 {offsets = [0, 24], sizes = [8, 8], strides = [1, 1]} : vector<8x32xf32> to vector<8x8xf32>
    %cst_26 = arith.constant dense<0.000000e+00> : vector<8x8xf32>
    %69 = tpu.matmul %67, %68, %cst_26 {dimension_numbers = #tpu.dot_dimension_numbers<[1], [1], [0], [0], [0, 0, 1, 0], [], []>} : vector<8x8xf32>, vector<8x8xf32>, vector<8x8xf32> -> vector<8x8xf32>
    %cst_27 = arith.constant dense<0xFF800000> : vector<8xf32>
    %70 = vector.multi_reduction <maximumf>, %69, %cst_27 [1] : vector<8x8xf32> to vector<8xf32>
    %71 = vector.shape_cast %70 : vector<8xf32> to vector<8x1xf32>
    %72 = vector.broadcast %71 : vector<8x1xf32> to vector<8x8xf32>
    %73 = arith.subf %69, %72 : vector<8x8xf32>
    %74 = math.exp %73 : vector<8x8xf32>
    %cst_28 = arith.constant dense<0.000000e+00> : vector<8xf32>
    %75 = vector.multi_reduction <add>, %74, %cst_28 [1] : vector<8x8xf32> to vector<8xf32>
    %76 = vector.shape_cast %75 : vector<8xf32> to vector<8x1xf32>
    %77 = tpu.reciprocal %76 {approx = true} : vector<8x1xf32> -> vector<8x1xf32>
    %78 = vector.broadcast %77 : vector<8x1xf32> to vector<8x8xf32>
    %79 = arith.mulf %74, %78 : vector<8x8xf32>
    %80 = vector.extract_strided_slice %11 {offsets = [0, 24], sizes = [8, 8], strides = [1, 1]} : vector<8x32xf32> to vector<8x8xf32>
    %cst_29 = arith.constant dense<0.000000e+00> : vector<8x8xf32>
    %81 = tpu.matmul %79, %80, %cst_29 {dimension_numbers = #tpu.dot_dimension_numbers<[1], [0], [0], [1], [0, 0, 1, 1], [], []>} : vector<8x8xf32>, vector<8x8xf32>, vector<8x8xf32> -> vector<8x8xf32>
    %c24 = arith.constant 24 : index
    %c0_30 = arith.constant 0 : index
    %82 = vector.load %arg6[%c24, %c0_30] : memref<32x32xf32, #tpu.memory_space<vmem>>, vector<8x32xf32>
    %cst_31 = arith.constant dense<0.000000e+00> : vector<8x32xf32>
    %83 = tpu.matmul %81, %82, %cst_31 {dimension_numbers = #tpu.dot_dimension_numbers<[1], [0], [0], [1], [0, 0, 1, 1], [], []>} : vector<8x8xf32>, vector<8x32xf32>, vector<8x32xf32> -> vector<8x32xf32>
    %84 = arith.addf %66, %83 : vector<8x32xf32>
    %85 = arith.addf %7, %84 : vector<8x32xf32>
    %c0_32 = arith.constant 0 : index
    %c0_33 = arith.constant 0 : index
    %86 = vector.load %arg7[%c0_32, %c0_33] : memref<1x32xf32, #tpu.memory_space<vmem>>, vector<1x32xf32>
    %87 = vector.shape_cast %86 : vector<1x32xf32> to vector<32xf32>
    %88 = vector.shape_cast %87 : vector<32xf32> to vector<1x32xf32>
    %89 = vector.broadcast %88 : vector<1x32xf32> to vector<8x32xf32>
    %90 = arith.addf %85, %89 : vector<8x32xf32>
    %c0_34 = arith.constant 0 : index
    %c0_35 = arith.constant 0 : index
    %c0_36 = arith.constant 0 : index
    %91 = vector.load %arg8[%c0_34, %c0_35, %c0_36] : memref<1x8x32xf32, #tpu.memory_space<vmem>>, vector<1x8x32xf32>
    %92 = vector.shape_cast %91 : vector<1x8x32xf32> to vector<8x32xf32>
    %93 = vector.shape_cast %90 : vector<8x32xf32> to vector<1x8x32xf32>
    tpu.vector_store %arg8[%c0_34, %c0_35, %c0_36], %93 {strides = array<i32>} : memref<1x8x32xf32, #tpu.memory_space<vmem>>, vector<1x8x32xf32>,
    return
  }
  func.func @transform_0(%arg0: i32, %arg1: i32) -> (i32, i32, i32) {
    %c0_i32 = arith.constant 0 : i32
    %c0_i32_0 = arith.constant 0 : i32
    %c0_i32_1 = arith.constant 0 : i32
    return %arg0, %c0_i32, %c0_i32_0 : i32, i32, i32
  }
  func.func @transform_1(%arg0: i32, %arg1: i32) -> (i32, i32) {
    %c0_i32 = arith.constant 0 : i32
    %c0_i32_0 = arith.constant 0 : i32
    %c0_i32_1 = arith.constant 0 : i32
    return %c0_i32, %c0_i32_0 : i32, i32
  }
  func.func @transform_2(%arg0: i32, %arg1: i32) -> (i32, i32) {
    %c0_i32 = arith.constant 0 : i32
    %c0_i32_0 = arith.constant 0 : i32
    %c0_i32_1 = arith.constant 0 : i32
    return %c0_i32, %c0_i32_0 : i32, i32
  }
  func.func @transform_3(%arg0: i32, %arg1: i32) -> (i32, i32) {
    %c0_i32 = arith.constant 0 : i32
    %c0_i32_0 = arith.constant 0 : i32
    %c0_i32_1 = arith.constant 0 : i32
    return %c0_i32, %c0_i32_0 : i32, i32
  }
  func.func @transform_4(%arg0: i32, %arg1: i32) -> (i32, i32) {
    %c0_i32 = arith.constant 0 : i32
    %c0_i32_0 = arith.constant 0 : i32
    %c0_i32_1 = arith.constant 0 : i32
    return %c0_i32, %c0_i32_0 : i32, i32
  }
  func.func @transform_5(%arg0: i32, %arg1: i32) -> (i32, i32) {
    %c0_i32 = arith.constant 0 : i32
    %c0_i32_0 = arith.constant 0 : i32
    %c0_i32_1 = arith.constant 0 : i32
    return %c0_i32, %c0_i32_0 : i32, i32
  }
  func.func @transform_6(%arg0: i32, %arg1: i32) -> (i32, i32, i32) {
    %c0_i32 = arith.constant 0 : i32
    %c0_i32_0 = arith.constant 0 : i32
    return %arg0, %arg1, %c0_i32 : i32, i32, i32
  }
}

</mosaic_0001>

<bundles_post_ra>
// kernel: tpu_custom_call.1
= control target key start
LH: loop header
LB: loop body
LE: loop exit
PB: predicated region body
PF: predicated region fallthrough
CT: control target
= control target key end

     0   :  { %s2267_s0 = inlined_call_operand.hbm [shape: f32[2,8,32], index: 0, kind: input, shape index: {}]   ;;  %s2268_s1 = inlined_call_operand.vmem [shape: f32[1,32], index: 1, kind: input, shape index: {}]   ;;  %s2269_s2 = inlined_call_operand.vmem [shape: f32[1,32], index: 2, kind: input, shape index: {}]   ;;  %s2270_s3 = inlined_call_operand.hbm [shape: f32[32,96], index: 3, kind: input, shape index: {}]   ;;  %s2271_s4 = inlined_call_operand.hbm [shape: f32[32,32], index: 4, kind: input, shape index: {}]   ;;  %s2272_s5 = inlined_call_operand.vmem [shape: f32[1,32], index: 5, kind: input, shape index: {}]   ;;  %s2273_s6 = inlined_call_operand.hbm [shape: f32[2,8,32], index: 6, kind: output, shape index: {}]  }
   0x1   :  { %2277 = sst [smem:[#allocation15_spill]] %s2270_s3 }
   0x2   :  { %2278 = sst [smem:[#allocation16_spill]] %s2271_s4 }
   0x3   :  { %11 = vsyncpa [#allocation6], 0 }
   0x4   :  { %13 = vsyncpa [#allocation6 + $0x1], 0 }
   0x5   :  { %14 = vsyncpa [#allocation9], 0 }
   0x6   :  { %15 = vsyncpa [#allocation7], 0 }
   0x7   :  { %17 = vsyncpa [#allocation7 + $0x1], 0  ;;  %s1985_s21 = smov 0   ;;  %s1987_s22 = smov 0  }
   0x8   :  { %s1989_s23 = smov 0   ;;  %s1991_s24 = smov 0  }
   0x9   :  { %s1993_s25 = smov 0   ;;  %s1995_s26 = smov 0  }
   0xa LB: > { %s1524_s27 = sadd.s32 4294967295, %s1935_s26   ;;  %s1525_s28 = sadd.s32 4294967294, %s1935_s26   ;;  %s1935_s26 = sphi %s1995_s26, %s23_s26   ;;  %s1931_s25 = sphi %s1993_s25, %s2297_s25   ;;  %s1927_s24 = sphi %s1991_s24, %s2296_s24   ;;  %s1923_s23 = sphi %s1989_s23, %s2295_s23   ;;  %s1919_s22 = sphi %s1987_s22, %s2294_s22   ;;  %s1915_s21 = sphi %s1985_s21, %s2293_s21  }
   0xb   : > { %p55_p0 = scmp.ne.s32.totalorder %s1919_s22, %s1915_s21  ;;  %p2019_p1 = scmp.eq.s32.totalorder %s1524_s27, 0 }
   0xc   : > { %p2023_p2 = scmp.eq.s32.totalorder %s1524_s27, 1  ;;  %p192_p3 = scmp.eq.s32.totalorder %s1525_s28, 1 }
   0xd   : > { %s2279_s29 = scalar_select %p2019_p1, 1, 0 }
   0xe   : > { %p2029_p4 = por %p2019_p1, %p55_p0  ;;  %p1526_p5 = scmp.ge.s32.totalorder %s1935_s26, 1 }
   0xf   : > { %p2034_p6 = por %p192_p3, %p55_p0  ;;  %p199_p7 = scmp.lt.s32.totalorder %s1935_s26, 3 }
  0x10   : > { %s2281_s7 = scalar_select %p2029_p4, 1, 0 }
  0x11   : > { %s2282_s8 = scalar_select %p2034_p6, 1, 0 }
  0x12   : > { %p2039_p8 = pnand %p1526_p5, %p199_p7  ;;  %s1937_s10 = smov [#allocation8]  }
  0x13   : > { %s217_s11 = sshll.u32 %s1937_s10, 4  ;;  %s1938_s13 = smov [#allocation10]   ;;  %s218_s11 = int_to_ptr.vmem [resolvable:$true] %s217_s11 }
  0x14   : > { %p1673_p9 = pneg %p2039_p8  ;;  %s230_s14 = sshll.u32 %s1938_s13, 4  ;;  %s231_s14 = int_to_ptr.vmem [resolvable:$true] %s230_s14 }
  0x15   : > { %s1782_s15 = scalar_lea.vmem %s218_s11, 512  ;;  %p1790_p5 = scmp.lt.s32.totalorder %s218_s11, %s218_s11 }
  0x16   : > { %p2048_p11 = pnand %p1673_p9, %p2019_p1  ;;  %p1783_p13 = scmp.ne.s32.totalorder %s218_s11, %s1782_s15 }
  0x17   : > { %p1791_p7 = scmp.lt.s32.totalorder %s1782_s15, %s1782_s15 }
  0x18   : > { %p1773_p12 = pneg %p2048_p11 }
  0x19   : > { %p1792_p10 = por %p1791_p7, %p1790_p5 }
  0x1a   : > { %p1785_p0 = pnand %p1783_p13, %p1773_p12 }
  0x1c   : > { %p1786_p3 = pneg %p1785_p0 }
  0x1e   : > { %p1793_p9 = pnand %p1792_p10, %p1786_p3 }
  0x20   : > { %1796 = shalt.err (!%p1793_p9)
}
  0x21   : > { %s1939_s16 = smov 128   ;;  %s1940_s17 = smov 8  }
  0x22   : > { %s2285_s3 = sld [smem:[#allocation15_spill]]  ;;  %s1808_s20 = scalar_lea.vmem %s231_s14, 512 }
  0x23   : > { %p1809_p6 = scmp.ne.s32.totalorder %s231_s14, %s1808_s20  ;;  %p1816_p1 = scmp.lt.s32.totalorder %s231_s14, %s231_s14 }
  0x24   : > { %p1817_p4 = scmp.lt.s32.totalorder %s1808_s20, %s1808_s20 }
  0x25   : > { %p1811_p13 = pnand %p1809_p6, %p1773_p12 }
  0x26   : > { %p1818_p5 = por %p1817_p4, %p1816_p1 }
  0x27   : > { %p1812_p0 = pneg %p1811_p13 }
  0x28   : > { %1676 = dma.hbm_to_vmem [thread:$0]  (!%p2048_p11), %s2285_s3, 512, %s218_s11, [#allocation9], %s1939_s16, %s1939_s16, %s1940_s17  }
  0x29   : > { %p1819_p10 = pnand %p1818_p5, %p1812_p0 }
  0x2b   : > { %1822 = shalt.err (!%p1819_p10)
}
  0x2c   : > { %s2286_s4 = sld [smem:[#allocation16_spill]]  ;;  %s35_s10 = sadd.s32 1, %s1931_s25 }
  0x2d   : > { %s42_s11 = sadd.s32 1, %s1923_s23  ;;  %p37_p1 = scmp.ge.s32.totalorder %s35_s10, 2 }
  0x2e   : > { %p49_p4 = scmp.ne.s32.totalorder %s1923_s23, %s1919_s22  ;;  %p50_p6 = scmp.eq.s32.totalorder %s1935_s26, 0 }
  0x2f   : > { %p1690_p12 = scmp.lt.s32.totalorder %s1935_s26, 2  ;;  %s2299_s10 = smov (%p37_p1, %s35_s10), 0 }
  0x30   : > { %p51_p3 = por %p50_p6, %p49_p4  ;;  %p2080_p7 = por %p2023_p2, %p49_p4 }
  0x31   : > { %s39_s13 = ssub.s32 %s1931_s25, %s2299_s10  ;;  %s247_s15 = sand.u32 1, %s1923_s23  }
  0x32   : > { %1679 = dma.hbm_to_vmem [thread:$0]  (!%p2048_p11), %s2286_s4, 512, %s231_s14, [#allocation9], %s1939_s16, %s1939_s16, %s1940_s17  }
  0x33   : > { %p40_p9 = scmp.eq.s32.totalorder %s39_s13, 0  ;;  %s1530_s14 = sshll.u32 %s247_s15, 3 }
  0x34   : > { %s1531_s16 = sshll.u32 %s1931_s25, 7  ;;  %s251_s27 = scalar_lea.vmem [#allocation5], %s1530_s14 }
  0x35   : > { %s2089_s17 = scalar_select %p40_p9, %s1923_s23, %s42_s11  }
  0x36   : > { %s256_s20 = scalar_lea.hbm %s2267_s0, %s1531_s16  ;;  %s258_s28 = sshll.u32 %s251_s27, 4  ;;  %s259_s28 = int_to_ptr.vmem [resolvable:$true] %s258_s28 }
  0x37   : > { %p2096_p11 = pnand %p1690_p12, %p51_p3  ;;  %s248_s3 = scalar_lea.sflag [#allocation6], %s247_s15 }
  0x38   : > { %s1836_s13 = scalar_lea.vmem %s259_s28, 128  ;;  %s1941_s11 = smov [#allocation5]  }
  0x39   : > { %p1825_p2 = pneg %p2096_p11  ;;  %p1837_p13 = scmp.ne.s32.totalorder %s259_s28, %s1836_s13 }
  0x3a   : > { %s1841_s4 = sshll.u32 %s1941_s11, 4  ;;  %s1842_s4 = int_to_ptr.vmem [resolvable:$false] %s1841_s4 }
  0x3b   : > { %p1839_p0 = pnand %p1837_p13, %p1825_p2  ;;  %s1843_s16 = scalar_lea.vmem %s1842_s4, 256 }
  0x3c   : > { %p1844_p10 = scmp.lt.s32.totalorder %s259_s28, %s1842_s4  ;;  %p1845_p1 = scmp.lt.s32.totalorder %s1843_s16, %s1836_s13 }
  0x3d   : > { %p1840_p5 = pneg %p1839_p0 }
  0x3e   : > { %p1846_p4 = por %p1845_p1, %p1844_p10 }
  0x40   : > { %p1847_p6 = pnand %p1846_p4, %p1840_p5 }
  0x42   : > { %1850 = shalt.err (!%p1847_p6)
}
  0x43   : > { %1683 = dma.hbm_to_vmem [thread:$0]  (!%p2096_p11), %s256_s20, 128, %s259_s28, %s248_s3  }
  0x44   : > { %267 = sbr.rel (%p2039_p8) target bundleno = 2943 (0xb7f), region = 44  ;;  %s2107_s15 = sand.u32 (!%p2039_p8), 1, %s1919_s22  }
  0x45   : > { %s1533_s14 = sshll.u32 (!%p2039_p8), %s2107_s15, 3  ;;  %s270_s18 = scalar_lea.sflag (!%p2039_p8), [#allocation6], %s2107_s15 }
  0x46   : > { %s273_s4 = scalar_lea.vmem (!%p2039_p8), [#allocation5], %s1533_s14  ;;  %p2289_p12 = scmp.ne.s32.totalorder (!%p2039_p8), %s2281_s7, 0 }
  0x49   : > { %1902 = dma.done.wait (%p2289_p12), %s270_s18, 128  }
  0x4a   : > { %1904 = vsyncadd (%p2289_p12), %s270_s18, 4294967168  ;;  %p2290_p3 = scmp.ne.s32.totalorder %s2279_s29, 0 }
  0x4c   : > { %1906 = dma.done.wait (%p2290_p3), [#allocation9], 1024  }
  0x4d   : > { %1908 = vsyncadd (%p2290_p3), [#allocation9], 4294966272  ;;  %v2121_v0 = vld [vmem:[%s273_s4] sm:$0xff]  ;;  %vm319_vm0 = vcmask 261120   ;;  %v1942_v9 = vmov 0.0   ;;  %vm1943_vm1 = vmmov 0  }
  0x4e   : > { %v318_v1 = vmul.f32 2.0, %v2121_v0  ;;  %v351_v8 = vld [vmem:[#allocation8 + $0x18] sm:$0xff]  ;;  %1590 = vmatprep.subr.mxu0 %v1942_v9  ;;  %v350_v10 = vld [vmem:[#allocation8 + $0x10] sm:$0xff]  ;;  %1598 = vmatprep.mubr.msk.f32.mxu0 %vm1943_vm1, %v1942_v9  ;;  %v349_v11 = vld [vmem:[#allocation8 + $0x8] sm:$0xff]  ;;  %s1944_s19 = smov 96   ;;  %s1945_s20 = smov 120  }
  0x4f   : > { %1591 = vmatpush3.msra.mxu0 %v351_v8  ;;  %1601 = vmatprep.subr.mxu1 %v1942_v9  ;;  %v348_v12 = vld [vmem:[#allocation8] sm:$0xff]  ;;  %v1537_v17 = vld [vmem:[%s2268_s1] ss:$0 sm:$0xff]  ;;  %vm441_vm2 = vcmask 64512   ;;  %s1946_s27 = smov 64   ;;  %s1947_s28 = smov 112  }
  0x50   : > { %v320_v2 = vsel %vm319_vm0, %v318_v1, 0.0  ;;  %1592 = vmatprep.subr.mxu0 %v1942_v9  ;;  %1603 = vmatprep.mubr.msk.f32.mxu1 %vm1943_vm1, %v1942_v9  ;;  %v1538_v19 = vld [vmem:[%s2269_s2] ss:$0 sm:$0xff]  ;;  %s1948_s30 = smov 104   ;;  %v769_v51 = vld [vmem:[#allocation10 + $0x8] sm:$0xff]  ;;  %v602_v55 = vld [vmem:[#allocation10] sm:$0xff] }
  0x51   : > { %321 = vadd.xlane.f32.xlu0 %v320_v2  ;;  %1593 = vmatpush3.msra.mxu0 %v350_v10  ;;  %s1558_s16 = sshll.u32 %s1927_s24, 7  ;;  %s309_s18 = scalar_lea.vmem [#allocation11], %s1533_s14 }
  0x52   : > { %1594 = vmatprep.subr.mxu0 %v1942_v9  ;;  %s1422_s4 = sshll.u32 %s309_s18, 4  ;;  %s1420_s7 = scalar_lea.hbm %s2273_s6, %s1558_s16  ;;  %s1423_s4 = int_to_ptr.vmem [resolvable:$true] %s1422_s4 }
  0x53   : > { %1595 = vmatpush3.msra.mxu0 %v349_v11  ;;  %s1408_s9 = scalar_lea.sflag [#allocation7], %s2107_s15  ;;  %s1949_s24 = smov [#allocation11]  }
  0x54   : > { %1596 = vmatprep.subr.mxu0 %v1942_v9 }
  0x55   : > { %1597 = vmatpush3.msra.mxu0 %v348_v12 }
  0x56   : > { %1611 = vmatprep.subr.mxu0 %v1942_v9 }
  0xda   : > { %v322_v3 = vpop.xlane.xlu0 %321 }
  0xdb   : > { %v324_v4 = vmul.f32 0.03125, %v322_v3 }
  0xdd   : > { %v325_v5 = vsub.f32 %v318_v1, %v324_v4 }
  0xdf   : > { %v326_v6 = vmul.f32 %v325_v5, %v325_v5 }
  0xe1   : > { %v327_v7 = vsel %vm319_vm0, %v326_v6, 0.0 }
  0xe2   : > { %328 = vadd.xlane.f32.xlu0 %v327_v7 }
 0x16b   : > { %v329_v13 = vpop.xlane.xlu0 %328 }
 0x16c   : > { %v330_v14 = vmul.f32 0.03125, %v329_v13 }
 0x16e   : > { %v331_v15 = vadd.f32 1e-05, %v330_v14 }
 0x170   : > { %1753 = vrsqrt.f32 %v331_v15 }
 0x17d   : > { %v1754_v16 = vpop.eup %1753 }
 0x17e   : > { %v333_v18 = vmul.f32 %v1754_v16, %v325_v5 }
 0x180   : > { %v340_v20 = vmul.f32 %v1537_v17, %v333_v18  ;;  %v1081_v18 = vld [vmem:[#allocation10 + $0x10] sm:$0xff] }
 0x182   : > { %v347_v21 = vadd.f32 %v1538_v19, %v340_v20 }
 0x184   : > { %1599 = vmatmul.mubr.msk.f32.vlgmr.msra.gmra.mxu0 %vm319_vm0, %v347_v21 }
 0x185   : > { %1613 = vmatprep.mubr.msk.f32.mxu0 %vm1943_vm1, %v1942_v9 }
 0x244   : > { %v421_v22 = vpop.f32.mrf.mxu0 }
 0x245   : > { %425 = vst.msk [vmem:[#allocation2] sm:$0xff] %vm319_vm0, %v421_v22  ;;  %427 = vrot.lane.b32.xlu1 %v421_v22, %s1944_s19  ;;  %s1851_s19 = scalar_lea.vmem %s1423_s4, 128 }
 0x246   : > { %v1600_v23 = vpop.f32.mrf.mxu0  ;;  %p1852_p8 = scmp.ne.s32.totalorder %s1423_s4, %s1851_s19 }
 0x248   : > { %p1853_p9 = pnand %p1852_p8, %p2080_p7 }
 0x24a   : > { %p1854_p11 = pneg %p1853_p9 }
 0x24c   : > { %v2146_v24 = vld [vmem:[#allocation2] sm:$0xff] }
 0x24d   : > { %603 = vrot.lane.b32.xlu0 %v2146_v24, %s1945_s20 }
 0x2b7   : > { %v428_v25 = vpop.permute.xlu1 %427 }
 0x2b8   : > { %430 = vst.msk [vmem:[#allocation3] sm:$0xff] %vm319_vm0, %v428_v25 }
 0x2bf   : > { %v439_v26 = vld [vmem:[#allocation3] sm:$0xff]  ;;  %v604_v28 = vpop.permute.xlu0 %603 }
 0x2c0   : > { %605 = vrot.lane.b32.xlu1 %v439_v26, %s1945_s20  ;;  %1602 = vmatpush3.xpose.msk.msra.mxu1 %vm441_vm2, %v439_v26 }
 0x2c1   : > { %1606 = vmatprep.subr.mxu1 %v1942_v9 }
 0x2c3   : > { %1604 = vmatmul.mubr.msk.f32.vlgmr.msra.gmra.mxu1 %vm441_vm2, %v2146_v24 }
 0x2c4   : > { %1608 = vmatprep.mubr.msk.f32.mxu1 %vm1943_vm1, %v1942_v9 }
 0x332   : > { %v606_v27 = vpop.permute.xlu1 %605 }
 0x333   : > { %1612 = vmatpush3.xpose.msk.msra.mxu0 %vm441_vm2, %v606_v27 }
 0x334   : > { %1621 = vmatprep.subr.mxu0 %v1942_v9 }
 0x336   : > { %1614 = vmatmul.mubr.msk.f32.vlgmr.msra.gmra.mxu0 %vm441_vm2, %v604_v28 }
 0x337   : > { %1623 = vmatprep.mubr.msk.f32.mxu0 %vm1943_vm1, %v1942_v9  ;;  %1622 = vmatpush3.msra.mxu0 %v769_v51 }
 0x338   : > { %1631 = vmatprep.subr.mxu0 %v1942_v9 }
 0x383   : > { %v514_v29 = vpop.f32.mrf.mxu1 }
 0x384   : > { %v518_v30 = vsel %vm441_vm2, %v514_v29, -inf }
 0x385   : > { %519 = vmax.xlane.f32.xlu1 %v518_v30  ;;  %v1605_v31 = vpop.f32.mrf.mxu1  ;;  %v1321_v30 = vld [vmem:[#allocation10 + $0x18] sm:$0xff] }
 0x396   : > { %431 = vrot.lane.b32.xlu1 %v421_v22, %s1946_s27 }
 0x3f6   : > { %v677_v32 = vpop.f32.mrf.mxu0 }
 0x3f7   : > { %v681_v33 = vsel %vm441_vm2, %v677_v32, -inf }
 0x3f8   : > { %682 = vmax.xlane.f32.xlu0 %v681_v33  ;;  %v1615_v34 = vpop.f32.mrf.mxu0 }
 0x40e   : > { %v520_v35 = vpop.xlane.xlu1 %519 }
 0x40f   : > { %v521_v36 = vsub.f32 %v514_v29, %v520_v35 }
 0x411   : > { %v522_v37 = vmul.f32 1.442695, %v521_v36 }
 0x412   : > { %v432_v38 = vpop.permute.xlu1 %431 }
 0x413   : > { %1755 = vpow2.f32 %v522_v37  ;;  %434 = vst.msk [vmem:[#allocation4] sm:$0xff] %vm319_vm0, %v432_v38 }
 0x41a   : > { %v2166_v39 = vld [vmem:[#allocation4] sm:$0xff] }
 0x41b   : > { %1607 = vmatpush3.msra.mxu1 %v2166_v39 }
 0x41c   : > { %1616 = vmatprep.subr.mxu1 %v1942_v9 }
 0x420   : > { %v1756_v40 = vpop.eup %1755 }
 0x421   : > { %v524_v41 = vsel %vm441_vm2, %v1756_v40, 0.0 }
 0x422   : > { %525 = vadd.xlane.f32.xlu0 %v524_v41  ;;  %v1556_v41 = vld [vmem:[%s2272_s5] ss:$0 sm:$0xff] }
 0x438   : > { %693 = vrot.lane.b32.xlu0 %v2166_v39, %s1945_s20  ;;  %s1855_s20 = sshll.u32 %s1949_s24, 4  ;;  %s1856_s20 = int_to_ptr.vmem [resolvable:$false] %s1855_s20 }
 0x439   : > { %s1857_s14 = scalar_lea.vmem %s1856_s20, 256  ;;  %p1858_p2 = scmp.lt.s32.totalorder %s1423_s4, %s1856_s20 }
 0x43a   : > { %p1859_p13 = scmp.lt.s32.totalorder %s1857_s14, %s1851_s19 }
 0x43c   : > { %918 = vrot.lane.b32.xlu0 %v439_v26, %s1947_s28  ;;  %p1860_p0 = por %p1859_p13, %p1858_p2 }
 0x43e   : > { %p1861_p5 = pnand %p1860_p0, %p1854_p11 }
 0x440   : > { %916 = vrot.lane.b32.xlu0 %v2146_v24, %s1947_s28 }
 0x481   : > { %v683_v42 = vpop.xlane.xlu0 %682 }
 0x482   : > { %v684_v43 = vsub.f32 %v677_v32, %v683_v42 }
 0x484   : > { %v685_v44 = vmul.f32 1.442695, %v684_v43 }
 0x486   : > { %1757 = vpow2.f32 %v685_v44 }
 0x493   : > { %v1758_v45 = vpop.eup %1757 }
 0x494   : > { %v687_v46 = vsel %vm441_vm2, %v1758_v45, 0.0 }
 0x495   : > { %688 = vadd.xlane.f32.xlu1 %v687_v46 }
 0x4a6   : > { %1005 = vrot.lane.b32.xlu1 %v2166_v39, %s1947_s28 }
 0x4aa   : > { %1158 = vrot.lane.b32.xlu1 %v439_v26, %s1948_s30 }
 0x4ab   : > { %v526_v47 = vpop.xlane.xlu0 %525 }
 0x4ac   : > { %1759 = vrcp.f32 %v526_v47 }
 0x4af   : > { %v694_v50 = vpop.permute.xlu0 %693 }
 0x4b3   : > { %v919_v59 = vpop.permute.xlu0 %918 }
 0x4b7   : > { %v917_v62 = vpop.permute.xlu0 %916 }
 0x4b9   : > { %v1760_v48 = vpop.eup %1759 }
 0x4ba   : > { %v528_v49 = vmul.f32 %v1760_v48, %v1756_v40 }
 0x4bc   : > { %1609 = vmatmul.mubr.msk.f32.vlgmr.msra.gmra.mxu1 %vm441_vm2, %v528_v49 }
 0x4bd   : > { %1617 = vmatpush3.msra.mxu1 %v694_v50  ;;  %1618 = vmatprep.mubr.msk.f32.mxu1 %vm1943_vm1, %v1942_v9 }
 0x4be   : > { %1626 = vmatprep.subr.mxu1 %v1942_v9 }
 0x51e   : > { %v689_v52 = vpop.xlane.xlu1 %688 }
 0x51f   : > { %1761 = vrcp.f32 %v689_v52 }
 0x522   : > { %v1006_v57 = vpop.permute.xlu1 %1005 }
 0x526   : > { %v1159_v13 = vpop.permute.xlu1 %1158 }
 0x52c   : > { %v1762_v53 = vpop.eup %1761 }
 0x52d   : > { %v691_v54 = vmul.f32 %v1762_v53, %v1758_v45 }
 0x52f   : > { %1619 = vmatmul.mubr.msk.f32.vlgmr.msra.gmra.mxu1 %vm441_vm2, %v691_v54 }
 0x530   : > { %1627 = vmatpush3.msra.mxu1 %v602_v55  ;;  %1628 = vmatprep.mubr.msk.f32.mxu1 %vm1943_vm1, %v1942_v9 }
 0x531   : > { %1636 = vmatprep.subr.mxu1 %v1942_v9 }
 0x57c   : > { %v598_v56 = vpop.f32.mrf.mxu1 }
 0x57d   : > { %1629 = vmatmul.mubr.msk.f32.vlgmr.msra.gmra.mxu1 %vm441_vm2, %v598_v56 }
 0x57e   : > { %1637 = vmatpush3.msra.mxu1 %v1006_v57  ;;  %v1610_v58 = vpop.f32.mrf.mxu1  ;;  %1638 = vmatprep.mubr.msk.f32.mxu1 %vm1943_vm1, %v1942_v9 }
 0x57f   : > { %1646 = vmatprep.subr.mxu1 %v1942_v9 }
 0x5ef   : > { %v765_v60 = vpop.f32.mrf.mxu1 }
 0x5f0   : > { %1624 = vmatmul.mubr.msk.f32.vlgmr.msra.gmra.mxu0 %vm441_vm2, %v765_v60 }
 0x5f1   : > { %1632 = vmatpush3.xpose.msk.msra.mxu0 %vm441_vm2, %v919_v59  ;;  %v1620_v61 = vpop.f32.mrf.mxu1  ;;  %1633 = vmatprep.mubr.msk.f32.mxu0 %vm1943_vm1, %v1942_v9 }
 0x5f2   : > { %1641 = vmatprep.subr.mxu0 %v1942_v9 }
 0x5f4   : > { %1634 = vmatmul.mubr.msk.f32.vlgmr.msra.gmra.mxu0 %vm441_vm2, %v917_v62 }
 0x5f5   : > { %1643 = vmatprep.mubr.msk.f32.mxu0 %vm1943_vm1, %v1942_v9  ;;  %1642 = vmatpush3.msra.mxu0 %v1081_v18 }
 0x5f6   : > { %1651 = vmatprep.subr.mxu0 %v1942_v9 }
 0x63d   : > { %v912_v63 = vpop.f32.mrf.mxu1 }
 0x63f   : > { %v1630_v1 = vpop.f32.mrf.mxu1 }
 0x6b0   : > { %v839_v2 = vpop.f32.mrf.mxu0 }
 0x6b2   : > { %v1625_v3 = vpop.f32.mrf.mxu0 }
 0x6b4   : > { %v990_v4 = vpop.f32.mrf.mxu0 }
 0x6b5   : > { %v994_v5 = vsel %vm441_vm2, %v990_v4, -inf }
 0x6b6   : > { %995 = vmax.xlane.f32.xlu0 %v994_v5  ;;  %v1635_v6 = vpop.f32.mrf.mxu0 }
 0x73f   : > { %v996_v7 = vpop.xlane.xlu0 %995 }
 0x740   : > { %v997_v8 = vsub.f32 %v990_v4, %v996_v7 }
 0x742   : > { %v998_v10 = vmul.f32 1.442695, %v997_v8 }
 0x744   : > { %1763 = vpow2.f32 %v998_v10 }
 0x751   : > { %v1764_v11 = vpop.eup %1763 }
 0x752   : > { %v1000_v12 = vsel %vm441_vm2, %v1764_v11, 0.0 }
 0x753   : > { %1001 = vadd.xlane.f32.xlu1 %v1000_v12 }
 0x764   : > { %1156 = vrot.lane.b32.xlu1 %v2146_v24, %s1948_s30 }
 0x7dc   : > { %v1002_v14 = vpop.xlane.xlu1 %1001 }
 0x7dd   : > { %1765 = vrcp.f32 %v1002_v14 }
 0x7e0   : > { %v1157_v17 = vpop.permute.xlu1 %1156 }
 0x7ea   : > { %v1766_v15 = vpop.eup %1765 }
 0x7eb   : > { %v1004_v16 = vmul.f32 %v1766_v15, %v1764_v11 }
 0x7ed   : > { %1639 = vmatmul.mubr.msk.f32.vlgmr.msra.gmra.mxu1 %vm441_vm2, %v1004_v16 }
 0x7ee   : > { %1647 = vmatpush3.xpose.msk.msra.mxu1 %vm441_vm2, %v1159_v13  ;;  %1648 = vmatprep.mubr.msk.f32.mxu1 %vm1943_vm1, %v1942_v9 }
 0x7ef   : > { %1656 = vmatprep.subr.mxu1 %v1942_v9 }
 0x7f1   : > { %1649 = vmatmul.mubr.msk.f32.vlgmr.msra.gmra.mxu1 %vm441_vm2, %v1157_v17 }
 0x7f2   : > { %1658 = vmatprep.mubr.msk.f32.mxu1 %vm1943_vm1, %v1942_v9  ;;  %1657 = vmatpush3.msra.mxu1 %v1321_v30 }
 0x8ad   : > { %v1077_v19 = vpop.f32.mrf.mxu1 }
 0x8ae   : > { %1644 = vmatmul.mubr.msk.f32.vlgmr.msra.gmra.mxu0 %vm441_vm2, %v1077_v19 }
 0x8af   : > { %v1640_v20 = vpop.f32.mrf.mxu1  ;;  %1653 = vmatprep.mubr.msk.f32.mxu0 %vm1943_vm1, %v1942_v9  ;;  %v913_v9 = vadd.f32 %v912_v63, %v839_v2 }
 0x8b1   : > { %v1230_v21 = vpop.f32.mrf.mxu1 }
 0x8b2   : > { %v1234_v22 = vsel %vm441_vm2, %v1230_v21, -inf }
 0x8b3   : > { %1235 = vmax.xlane.f32.xlu0 %v1234_v22  ;;  %v1650_v23 = vpop.f32.mrf.mxu1 }
 0x8c9   : > { %1245 = vrot.lane.b32.xlu0 %v2166_v39, %s1948_s30 }
 0x93c   : > { %v1236_v24 = vpop.xlane.xlu0 %1235 }
 0x93d   : > { %v1237_v25 = vsub.f32 %v1230_v21, %v1236_v24 }
 0x93f   : > { %v1238_v26 = vmul.f32 1.442695, %v1237_v25 }
 0x940   : > { %v1246_v27 = vpop.permute.xlu0 %1245 }
 0x941   : > { %1767 = vpow2.f32 %v1238_v26  ;;  %1652 = vmatpush3.msra.mxu0 %v1246_v27 }
 0x94e   : > { %v1768_v28 = vpop.eup %1767 }
 0x94f   : > { %v1240_v29 = vsel %vm441_vm2, %v1768_v28, 0.0 }
 0x950   : > { %1241 = vadd.xlane.f32.xlu1 %v1240_v29 }
 0x96e   : > { %v1151_v31 = vpop.f32.mrf.mxu0 }
 0x96f   : > { %v1155_v32 = vadd.f32 %v1151_v31, %v913_v9 }
 0x970   : > { %v1645_v33 = vpop.f32.mrf.mxu0 }
 0x9d9   : > { %v1242_v34 = vpop.xlane.xlu1 %1241 }
 0x9da   : > { %1769 = vrcp.f32 %v1242_v34 }
 0x9e7   : > { %v1770_v35 = vpop.eup %1769 }
 0x9e8   : > { %v1244_v36 = vmul.f32 %v1770_v35, %v1768_v28 }
 0x9ea   : > { %1654 = vmatmul.mubr.msk.f32.vlgmr.msra.gmra.mxu0 %vm441_vm2, %v1244_v36 }
 0xaaa   : > { %v1317_v37 = vpop.f32.mrf.mxu0 }
 0xaab   : > { %1659 = vmatmul.mubr.msk.f32.vlgmr.msra.gmra.mxu1 %vm441_vm2, %v1317_v37 }
 0xaac   : > { %v1655_v38 = vpop.f32.mrf.mxu0 }
 0xb6b   : > { %v1391_v39 = vpop.f32.mrf.mxu1 }
 0xb6c   : > { %v1395_v40 = vadd.f32 %v1391_v39, %v1155_v32 }
 0xb6d   : > { %v1660_v42 = vpop.f32.mrf.mxu1 }
 0xb6e   : > { %v1396_v43 = vadd.f32 %v1395_v40, %v2121_v0 }
 0xb70   : > { %v1404_v44 = vadd.f32 %v1556_v41, %v1396_v43 }
 0xb72   : > { %1406 = vst.msk [vmem:[%s309_s18] sm:$0xff] %vm319_vm0, %v1404_v44 }
 0xb73   : > { %1864 = shalt.err (!%p1861_p5)
}
 0xb74   : > { %s1865_s27 = scalar_lea.hbm %s1420_s7, 128  ;;  %s1869_s30 = scalar_lea.hbm %s2273_s6, 256 }
 0xb75   : > { %p1866_p10 = scmp.ne.s32.totalorder %s1420_s7, %s1865_s27  ;;  %p1870_p6 = scmp.lt.s32.totalorder %s1420_s7, %s2273_s6 }
 0xb76   : > { %p1871_p12 = scmp.lt.s32.totalorder %s1869_s30, %s1865_s27 }
 0xb77   : > { %p1867_p1 = pnand %p1866_p10, %p2080_p7 }
 0xb78   : > { %p1872_p3 = por %p1871_p12, %p1870_p6 }
 0xb79   : > { %p1868_p4 = pneg %p1867_p1 }
 0xb7b   : > { %p1873_p8 = pnand %p1872_p3, %p1868_p4 }
 0xb7d   : > { %1876 = shalt.err (!%p1873_p8)
}
 0xb7e   : > { %1671 = dma.vmem_to_hbm [thread:$0]  (%p2080_p7), %s1423_s4, 128, %s1420_s7, %s1408_s9  }
 0xb7f PF: > { %s1434_s16 = sand.u32 1, %s1915_s21   ;;  %p2291_p9 = scmp.ne.s32.totalorder %s2282_s8, 0 }
 0xb80   : > { %p2292_p11 = scmp.ge.s32.totalorder %s1935_s26, 2  ;;  %s1435_s18 = scalar_lea.sflag [#allocation7], %s1434_s16 }
 0xb82   : > { %p1685_p2 = pnand %p2292_p11, %p2291_p9 }
 0xb84   : > { %p1686_p13 = pneg %p1685_p2 }
 0xb86   : > { %1910 = dma.done.wait (%p1686_p13), %s1435_s18, 128  }
 0xb87   : > { %1912 = vsyncadd (%p1686_p13), %s1435_s18, 4294967168  ;;  %s23_s26 = sadd.s32 1, %s1935_s26   ;;  %s2293_s21 = smov %s1919_s22 }
 0xb88   : > { %p20_p0 = scmp.ge.s32.totalorder %s23_s26, 4   ;;  %s2294_s22 = smov %s1923_s23 }
 0xb89   : > { %s2295_s23 = smov %s2089_s17  ;;  %s2296_s24 = smov %s1931_s25 }
 0xb8a   : > { %s2297_s25 = smov %s2299_s10  ;;  %22 = sbr.rel (!%p20_p0) target bundleno = 10 (0xa), region = 103 }
 0xb8f   :  { %1440 = vsyncpa [#allocation6], 1 }
 0xb90   :  { %1442 = vsyncpa [#allocation6 + $0x1], 1 }
 0xb91   :  { %1443 = vsyncpa [#allocation9], 1 }
 0xb92   :  { %1444 = vsyncpa [#allocation7], 1 }
 0xb93   :  { %1446 = vsyncpa [#allocation7 + $0x1], 1 }

</bundles_post_ra>
